<compile_context>
chip_gen: v6e
topology: v6e:2x2x1
jax: 0.10.0
libtpu: 0.0.40
codegen_flags: <defaults>
</compile_context>

<pallas_src>
import functools

import jax
import jax.numpy as jnp
from jax.experimental import pallas as pl
from jax.experimental.pallas import tpu as pltpu


def _round_up(n: int, m: int) -> int:
    return (n + m - 1) // m * m


def _review_classifier_kernel(x_ref, w_ref, b_ref, o_ref, acc_ref, *,
                              apply_sigmoid: bool, num_features: int,
                              block_k: int, acc_width: int):
    # x_ref: (TB, TK) VMEM (native dtype)   w_ref: (1, TK) f32 VMEM (lane-dense)
    # b_ref: (1, 1) f32 SMEM                o_ref: (TB, 1) f32 VMEM
    # acc_ref: (TB, acc_width) f32 VMEM scratch (lane-dense partial sums)
    k = pl.program_id(1)
    nk = pl.num_programs(1)

    @pl.when(k == 0)
    def _init():
        acc_ref[...] = jnp.zeros_like(acc_ref)

    groups = block_k // acc_width  # exact by construction

    def _accumulate(masked: bool):
        acc = acc_ref[...]
        for g in range(groups):
            lo = g * acc_width
            xg = x_ref[:, lo:lo + acc_width].astype(jnp.float32)   # cast in-kernel
            wg = w_ref[:, lo:lo + acc_width]                        # (1, W) f32
            prod = xg * wg                                          # VPU, sublane-bcast
            if masked:
                col = (k * block_k + lo
                       + jax.lax.broadcasted_iota(jnp.int32, prod.shape, 1))
                # Select on the product: OOB lanes become exactly 0 even if the
                # padded read region of x or w contains NaN/Inf garbage.
                prod = jnp.where(col < num_features, prod, 0.0)
            acc = acc + prod
        acc_ref[...] = acc

    if num_features % block_k == 0:
        _accumulate(masked=False)            # every K tile fully in bounds
    else:
        @pl.when(k != nk - 1)
        def _full_tiles():
            _accumulate(masked=False)

        @pl.when(k == nk - 1)
        def _remainder_tile():
            _accumulate(masked=True)

    @pl.when(k == nk - 1)
    def _finalize():
        y = jnp.sum(acc_ref[...], axis=1, keepdims=True) + b_ref[0, 0]
        if apply_sigmoid:
            y = jax.nn.sigmoid(y)
        o_ref[...] = y.astype(o_ref.dtype)


def review_classifier_forward(x, weight, bias, apply_sigmoid: bool = False,
                              *, block_b: int | None = None,
                              block_f: int | None = None):
    """x: (B, F) float (f32 or bf16); weight: (1, F); bias: (1,).

    Returns y of shape (B,) in f32, matching `fc1(x).squeeze()` (+ optional sigmoid).
    block_b / block_f optionally force the batch / feature tile sizes (testing).
    """
    B, F = x.shape
    itemsize = jnp.dtype(x.dtype).itemsize
    w = weight.reshape(1, F).astype(jnp.float32)      # lane-dense weight row (tiny)
    b = bias.reshape(1, 1).astype(jnp.float32)

    # ---- Generation-aware VMEM budget. ----
    try:
        vmem_cap = int(pltpu.get_tpu_info().vmem_capacity_bytes)
    except Exception:
        vmem_cap = 64 * 1024 * 1024                   # conservative (v7x per-core)
    if vmem_cap <= 0:
        vmem_cap = 64 * 1024 * 1024
    vmem_limit = min((3 * vmem_cap) // 4, 96 * 1024 * 1024)   # 48 MiB v7x, 96 MiB v5e/v6e
    x_buf_budget = vmem_limit // 3                    # per buffer; x is double-buffered

    # Row alignment of the batch tile: (8,128) for f32, (16,128) for bf16, ...
    row_align = max(8, 32 // itemsize)

    # ---- Feature tile: whole F resident when reasonable, else 128-lane multiples. ----
    MAX_TK = 8192
    if block_f is not None:
        if block_f != F and block_f % 128 != 0:
            raise ValueError("block_f must equal num_features or be a multiple of 128")
        TK = block_f
    else:
        TK = F if F <= MAX_TK else MAX_TK

    # ---- Batch tile: as big as the x-buffer budget allows, but split for megacore. ----
    if block_b is not None:
        if block_b % row_align != 0:
            raise ValueError(f"block_b must be a multiple of {row_align}")
        TB = block_b
    else:
        TB = x_buf_budget // max(TK * itemsize, 1)
        TB = max(row_align, (TB // row_align) * row_align)
        TB = min(TB, 8192)                            # keeps the (TB,128) accumulator small
        TB = min(TB, _round_up(B, row_align))         # don't over-allocate small batches
        if B >= 2 * row_align:                        # >=2 batch steps -> both v7x TCs busy
            TB = min(TB, max(row_align, (B // 2) // row_align * row_align))

    grid = (pl.cdiv(B, TB), pl.cdiv(F, TK))
    acc_width = 128 if TK % 128 == 0 else TK          # TK < 128 only when TK == F

    cost = pl.CostEstimate(
        flops=2 * B * F,
        transcendentals=B if apply_sigmoid else 0,
        bytes_accessed=(B * F * itemsize              # x, streamed exactly once
                        + grid[0] * F * 4             # weight, re-read per batch tile
                        + B * 4 + 4),                 # output + bias
    )

    out = pl.pallas_call(
        functools.partial(_review_classifier_kernel,
                          apply_sigmoid=apply_sigmoid, num_features=F,
                          block_k=TK, acc_width=acc_width),
        out_shape=jax.ShapeDtypeStruct((B, 1), jnp.float32),
        grid_spec=pltpu.PrefetchScalarGridSpec(
            num_scalar_prefetch=0,
            grid=grid,
            in_specs=[
                pl.BlockSpec((TB, TK), lambda i, k: (i, k)),        # streamed x tile (native dtype)
                pl.BlockSpec((1, TK), lambda i, k: (0, k)),         # lane-dense weight block
                pl.BlockSpec(memory_space=pltpu.MemorySpace.SMEM),  # bias scalar in SMEM
            ],
            out_specs=pl.BlockSpec((TB, 1), lambda i, k: (i, 0)),   # resident across K (reduction)
            scratch_shapes=[pltpu.VMEM((TB, acc_width), jnp.float32)],
        ),
        compiler_params=pltpu.CompilerParams(
            dimension_semantics=("parallel", "arbitrary"),          # batch shards across v7x TCs
            vmem_limit_bytes=vmem_limit,
        ),
        cost_estimate=cost,
    )(x, w, b)

    # TODO(synk): PyTorch .squeeze() returns a 0-d tensor when batch == 1; we always return (batch,).
    return out.reshape(B)


if __name__ == "__main__":
    key = jax.random.PRNGKey(0)
    k_x, k_w, k_b, k_x2, k_x3 = jax.random.split(key, 5)

    # --- Test 1: module-sized small shapes (single tile, full feature dim) ---
    batch, num_features = 8, 32
    bound = 1.0 / (num_features ** 0.5)
    weight = jax.random.uniform(k_w, (1, num_features), jnp.float32, -bound, bound)
    bias = jax.random.uniform(k_b, (1,), jnp.float32, -bound, bound)
    x = jax.random.normal(k_x, (batch, num_features), jnp.float32)

    y = jax.block_until_ready(review_classifier_forward(x, weight, bias, apply_sigmoid=False))
    y_sig = jax.block_until_ready(review_classifier_forward(x, weight, bias, apply_sigmoid=True))
    y_ref = (x @ weight.T + bias).reshape(batch)
    assert y.shape == (batch,)
    assert jnp.allclose(y, y_ref, atol=1e-5, rtol=1e-5)
    assert jnp.allclose(y_sig, jax.nn.sigmoid(y_ref), atol=1e-5, rtol=1e-5)

    # --- Test 2: tiled K path + in-kernel feature-remainder mask + batch remainder ---
    batch2, num_features2 = 20, 200
    bound2 = 1.0 / (num_features2 ** 0.5)
    k_w2, k_b2 = jax.random.split(k_b, 2)
    weight2 = jax.random.uniform(k_w2, (1, num_features2), jnp.float32, -bound2, bound2)
    bias2 = jax.random.uniform(k_b2, (1,), jnp.float32, -bound2, bound2)
    x2 = jax.random.normal(k_x2, (batch2, num_features2), jnp.float32)

    y2 = jax.block_until_ready(
        review_classifier_forward(x2, weight2, bias2, apply_sigmoid=True,
                                  block_b=8, block_f=128))
    y2_ref = jax.nn.sigmoid((x2 @ weight2.T + bias2).reshape(batch2))
    assert y2.shape == (batch2,)
    assert jnp.allclose(y2, y2_ref, atol=1e-5, rtol=1e-5)

    # --- Test 3: bf16 x streamed in native dtype (halved HBM traffic), f32 accumulation ---
    batch3, num_features3 = 32, 256
    bound3 = 1.0 / (num_features3 ** 0.5)
    k_w3, k_b3 = jax.random.split(k_w2, 2)
    weight3 = jax.random.uniform(k_w3, (1, num_features3), jnp.float32, -bound3, bound3)
    bias3 = jax.random.uniform(k_b3, (1,), jnp.float32, -bound3, bound3)
    x3 = jax.random.normal(k_x3, (batch3, num_features3), jnp.float32).astype(jnp.bfloat16)

    y3 = jax.block_until_ready(review_classifier_forward(x3, weight3, bias3, apply_sigmoid=False))
    y3_ref = (x3.astype(jnp.float32) @ weight3.T + bias3).reshape(batch3)
    assert y3.shape == (batch3,)
    assert jnp.allclose(y3, y3_ref, atol=1e-4, rtol=1e-4)

    print("KERNEL_OK")
</pallas_src>

<mosaic_0001>
module attributes {stable_mosaic.version = 11 : i64} {
  func.func @_review_classifier_kernel(%arg0: i32, %arg1: i32, %arg2: memref<8x32xf32, #tpu.memory_space<vmem>>, %arg3: memref<1x32xf32, #tpu.memory_space<vmem>>, %arg4: memref<1x1xf32, #tpu.memory_space<smem>>, %arg5: memref<8x1xf32, #tpu.memory_space<vmem>>, %arg6: memref<8x32xf32, #tpu.memory_space<vmem>>) attributes {dimension_semantics = [#tpu.dimension_semantics<parallel>, #tpu.dimension_semantics<arbitrary>], iteration_bounds = array<i64: 1, 1>, scalar_prefetch = 0 : i64, scratch_operands = 1 : i64, tpu.core_type = #tpu.core_type<tc>, window_params = [{transform_indices = @transform_0, window_bounds = array<i64: 8, 32>}, {transform_indices = @transform_1, window_bounds = array<i64: 1, 32>}, {transform_indices = @transform_2, window_bounds = array<i64: 1, 1>}, {transform_indices = @transform_3, window_bounds = array<i64: 8, 1>}]} {
    %c0_i32 = arith.constant 0 : i32
    %0 = arith.cmpi eq, %arg1, %c0_i32 : i32
    %1 = arith.extui %0 : i1 to i32
    %c0_i32_0 = arith.constant 0 : i32
    %2 = arith.cmpi ne, %1, %c0_i32_0 : i32
    scf.if %2 {
      %cst = arith.constant 0.000000e+00 : f32
      %13 = vector.broadcast %cst : f32 to vector<8x32xf32>
      %c0_10 = arith.constant 0 : index
      %c0_11 = arith.constant 0 : index
      %14 = vector.load %arg6[%c0_10, %c0_11] : memref<8x32xf32, #tpu.memory_space<vmem>>, vector<8x32xf32>
      tpu.vector_store %arg6[%c0_10, %c0_11], %13 {strides = array<i32>} : memref<8x32xf32, #tpu.memory_space<vmem>>, vector<8x32xf32>,
    } else {
    }
    %c0 = arith.constant 0 : index
    %c0_1 = arith.constant 0 : index
    %3 = vector.load %arg6[%c0, %c0_1] : memref<8x32xf32, #tpu.memory_space<vmem>>, vector<8x32xf32>
    %c0_2 = arith.constant 0 : index
    %c0_3 = arith.constant 0 : index
    %4 = vector.load %arg2[%c0_2, %c0_3] : memref<8x32xf32, #tpu.memory_space<vmem>>, vector<8x32xf32>
    %c0_4 = arith.constant 0 : index
    %c0_5 = arith.constant 0 : index
    %5 = vector.load %arg3[%c0_4, %c0_5] : memref<1x32xf32, #tpu.memory_space<vmem>>, vector<1x32xf32>
    %6 = vector.broadcast %5 : vector<1x32xf32> to vector<8x32xf32>
    %7 = arith.mulf %4, %6 : vector<8x32xf32>
    %8 = arith.addf %3, %7 : vector<8x32xf32>
    %c0_6 = arith.constant 0 : index
    %c0_7 = arith.constant 0 : index
    %9 = vector.load %arg6[%c0_6, %c0_7] : memref<8x32xf32, #tpu.memory_space<vmem>>, vector<8x32xf32>
    tpu.vector_store %arg6[%c0_6, %c0_7], %8 {strides = array<i32>} : memref<8x32xf32, #tpu.memory_space<vmem>>, vector<8x32xf32>,
    %c0_i32_8 = arith.constant 0 : i32
    %10 = arith.cmpi eq, %arg1, %c0_i32_8 : i32
    %11 = arith.extui %10 : i1 to i32
    %c0_i32_9 = arith.constant 0 : i32
    %12 = arith.cmpi ne, %11, %c0_i32_9 : i32
    scf.if %12 {
      %c0_10 = arith.constant 0 : index
      %c0_11 = arith.constant 0 : index
      %13 = vector.load %arg6[%c0_10, %c0_11] : memref<8x32xf32, #tpu.memory_space<vmem>>, vector<8x32xf32>
      %cst = arith.constant dense<0.000000e+00> : vector<8xf32>
      %14 = vector.multi_reduction <add>, %13, %cst [1] : vector<8x32xf32> to vector<8xf32>
      %15 = vector.shape_cast %14 : vector<8xf32> to vector<8x1xf32>
      %c0_12 = arith.constant 0 : index
      %c0_13 = arith.constant 0 : index
      %16 = memref.load %arg4[%c0_12, %c0_13] : memref<1x1xf32, #tpu.memory_space<smem>>
      %17 = vector.broadcast %16 : f32 to vector<8x1xf32>
      %18 = arith.addf %15, %17 : vector<8x1xf32>
      %c0_14 = arith.constant 0 : index
      %c0_15 = arith.constant 0 : index
      %19 = vector.load %arg5[%c0_14, %c0_15] : memref<8x1xf32, #tpu.memory_space<vmem>>, vector<8x1xf32>
      tpu.vector_store %arg5[%c0_14, %c0_15], %18 {strides = array<i32>} : memref<8x1xf32, #tpu.memory_space<vmem>>, vector<8x1xf32>,
    } else {
    }
    return
  }
  func.func @transform_0(%arg0: i32, %arg1: i32) -> (i32, i32) {
    %c0_i32 = arith.constant 0 : i32
    return %arg0, %arg1 : i32, i32
  }
  func.func @transform_1(%arg0: i32, %arg1: i32) -> (i32, i32) {
    %c0_i32 = arith.constant 0 : i32
    %c0_i32_0 = arith.constant 0 : i32
    return %c0_i32, %arg1 : i32, i32
  }
  func.func @transform_2(%arg0: i32, %arg1: i32) -> (i32, i32) {
    %c0_i32 = arith.constant 0 : i32
    %c0_i32_0 = arith.constant 0 : i32
    %c0_i32_1 = arith.constant 0 : i32
    return %c0_i32, %c0_i32_0 : i32, i32
  }
  func.func @transform_3(%arg0: i32, %arg1: i32) -> (i32, i32) {
    %c0_i32 = arith.constant 0 : i32
    %c0_i32_0 = arith.constant 0 : i32
    return %arg0, %c0_i32 : i32, i32
  }
}

</mosaic_0001>

<bundles_post_ra>
// kernel: tpu_custom_call.1
= control target key start
LH: loop header
LB: loop body
LE: loop exit
PB: predicated region body
PF: predicated region fallthrough
CT: control target
= control target key end

     0   :  { %9 = vsyncpa [#allocation5], 0  ;;  %s88_s12 = smov [#allocation4]   ;;  %s122_s0 = inlined_call_operand.hbm [shape: f32[8,32], index: 0, kind: input, shape index: {}]   ;;  %s123_s1 = inlined_call_operand.vmem [shape: f32[1,32], index: 1, kind: input, shape index: {}]   ;;  %s124_s2 = inlined_call_operand.<no memory space> [shape: f32[1,1], index: 2, kind: input, shape index: {}]   ;;  %s125_s3 = inlined_call_operand.vmem [shape: f32[8,1], index: 3, kind: output, shape index: {}]  }
   0x1   :  { %s16_s13 = sshll.u32 %s88_s12, 4  ;;  %s17_s13 = int_to_ptr.vmem [resolvable:$true] %s16_s13 }
   0x2   :  { %s74_s14 = scalar_lea.vmem %s17_s13, 128  ;;  %p79_p1 = scmp.lt.s32.totalorder %s17_s13, %s17_s13 }
   0x3   :  { %p75_p0 = scmp.ne.s32.totalorder %s17_s13, %s74_s14  ;;  %p80_p2 = scmp.lt.s32.totalorder %s74_s14, %s74_s14 }
   0x5   :  { %p81_p3 = por %p80_p2, %p79_p1 }
   0x7   :  { %p82_p4 = pnand %p81_p3, %p75_p0 }
   0x9   :  { %85 = shalt.err (!%p82_p4)
}
   0xa   :  { %19 = dma.hbm_to_vmem [thread:$0]  %s122_s0, 128, %s17_s13, [#allocation5]  }
   0xb   :  { %86 = dma.done.wait [#allocation5], 128  }
   0xc   :  { %87 = vsyncadd [#allocation5], 4294967168  ;;  %vm31_vm0 = vcmask 261120   ;;  %v89_v0 = vmov 0.0   ;;  %v34_v1 = vld [vmem:[#allocation4] sm:$0xff]  ;;  %v54_v8 = vstv %s124_s2  ;;  %vm56_vm1 = vcmask 7168  }
   0xd   :  { %32 = vst.msk [vmem:[#allocation2] sm:$0xff] %vm31_vm0, %v89_v0  ;;  %v63_v2 = vld [vmem:[%s123_s1] ss:$0 sm:$0xff] }
   0xe   :  { %v42_v4 = vmul.f32 %v63_v2, %v34_v1 }
  0x14   :  { %v33_v3 = vld [vmem:[#allocation2] sm:$0xff] }
  0x15   :  { %v43_v5 = vadd.f32 %v42_v4, %v33_v3 }
  0x17   :  { %45 = vst.msk [vmem:[#allocation2] sm:$0xff] %vm31_vm0, %v43_v5 }
  0x1e   :  { %v49_v6 = vld [vmem:[#allocation2] sm:$0xff] }
  0x1f   :  { %v50_v7 = vsel %vm31_vm0, %v49_v6, 0.0 }
  0x20   :  { %51 = vadd.xlane.f32.xlu0 %v50_v7 }
  0xa9   :  { %v52_v9 = vpop.xlane.xlu0 %51 }
  0xaa   :  { %v55_v10 = vadd.f32 %v54_v8, %v52_v9 }
  0xac   :  { %57 = vst.msk [vmem:[%s125_s3] sm:$0xff] %vm56_vm1, %v55_v10 }
  0xad   :  { %62 = vsyncpa [#allocation5], 1 }

</bundles_post_ra>
